<compile_context>
chip_gen: v7x
topology: tpu7x:2x2x1
jax: 0.10.0
libtpu: 0.0.40
codegen_flags: <defaults>
</compile_context>

<pallas_src>
import functools

import jax
import jax.numpy as jnp
from jax.experimental import pallas as pl
from jax.experimental.pallas import tpu as pltpu


def _round_up(x, m):
    return ((x + m - 1) // m) * m


def _fused_mlp_kernel(x_ref, w_ref, b_ref, o_ref, *, num_layers):
    """All MLP layers in one kernel invocation.

    x_ref : (M_pad, P)   padded input activation
    w_ref : (L, P, P)    pre-transposed, zero-padded weights ((in, out) layout)
    b_ref : (L, 1, P)    zero-padded biases
    o_ref : (M_pad, P)   padded output
    """
    act = x_ref[...]
    for i in range(num_layers):                      # static unroll
        act = jnp.dot(act, w_ref[i], preferred_element_type=jnp.float32)
        act = act + b_ref[i]                         # (1, P) broadcasts over rows
        if i < num_layers - 1:                       # ReLU on all but last layer
            act = jnp.maximum(act, 0.0)
    o_ref[...] = act.astype(o_ref.dtype)


@functools.partial(jax.jit, static_argnames=("num_layers", "out_dim"))
def fused_mlp_forward(x, w_stack, b_stack, *, num_layers, out_dim):
    m, k = x.shape
    num_l, p, _ = w_stack.shape
    m_pad = _round_up(max(m, 8), 8)

    # Zero-pad input to (M_pad, P).  Padded rows/lanes stay exactly zero
    # through every layer, so slicing at the end recovers the exact result.
    x_pad = jnp.zeros((m_pad, p), x.dtype).at[:m, :k].set(x)

    kernel = functools.partial(_fused_mlp_kernel, num_layers=num_layers)
    out_pad = pl.pallas_call(
        kernel,
        out_shape=jax.ShapeDtypeStruct((m_pad, p), x.dtype),
        grid=(1,),
        in_specs=[
            pl.BlockSpec((m_pad, p), lambda i: (0, 0)),
            pl.BlockSpec((num_l, p, p), lambda i: (0, 0, 0)),
            pl.BlockSpec((num_l, 1, p), lambda i: (0, 0, 0)),
        ],
        out_specs=pl.BlockSpec((m_pad, p), lambda i: (0, 0)),
        compiler_params=pltpu.CompilerParams(
            dimension_semantics=("arbitrary",)),
    )(x_pad, w_stack, b_stack)

    return out_pad[:m, :out_dim]


class SimpleMLPPallas:
    """Mirror of the PyTorch SimpleMLP forward pass."""

    def __init__(self, in_dim, hidden_dim, out_dim, num_layers, key):
        self.num_layers = num_layers
        self.in_dim = in_dim
        self.hidden_dim = hidden_dim
        self.out_dim = out_dim

        # Common lane-dense padded feature width.
        self.p = max(_round_up(d, 128) for d in (in_dim, hidden_dim, out_dim))

        self.params = []                                     # PyTorch-layout params
        w_stack = jnp.zeros((num_layers, self.p, self.p), jnp.float32)
        b_stack = jnp.zeros((num_layers, 1, self.p), jnp.float32)

        for i in range(num_layers):
            layer_in = in_dim if i == 0 else hidden_dim
            layer_out = out_dim if i == num_layers - 1 else hidden_dim
            key, kw, kb = jax.random.split(key, 3)
            # Deterministic init (uniform, nn.Linear-like fan-in scaling).
            bound = 1.0 / (layer_in ** 0.5)
            w = jax.random.uniform(kw, (layer_out, layer_in),
                                   minval=-bound, maxval=bound,
                                   dtype=jnp.float32)
            b = jax.random.uniform(kb, (layer_out,),
                                   minval=-bound, maxval=bound,
                                   dtype=jnp.float32)
            self.params.append((w, b))
            # Pre-transpose ONCE to (in, out) layout and zero-pad to (P, P).
            w_stack = w_stack.at[i, :layer_in, :layer_out].set(w.T)
            b_stack = b_stack.at[i, 0, :layer_out].set(b)

        self.w_stack = w_stack
        self.b_stack = b_stack

    def __call__(self, x):
        return fused_mlp_forward(x, self.w_stack, self.b_stack,
                                 num_layers=self.num_layers,
                                 out_dim=self.out_dim)


def _reference_forward(params, x, num_layers):
    for i, (w, b) in enumerate(params):
        x = x @ w.T + b
        if i < num_layers - 1:
            x = jnp.maximum(x, 0.0)
    return x


if __name__ == "__main__":
    key = jax.random.PRNGKey(0)
    key, kx, kp = jax.random.split(key, 3)

    batch, in_dim, hidden_dim, out_dim, num_layers = 8, 32, 64, 16, 3
    x = jax.random.normal(kx, (batch, in_dim), dtype=jnp.float32)

    mlp = SimpleMLPPallas(in_dim, hidden_dim, out_dim, num_layers, kp)

    out = mlp(x)
    out = jax.block_until_ready(out)

    # Correctness check against a pure-JAX reference of the same math.
    ref = _reference_forward(mlp.params, x, num_layers)
    assert out.shape == (batch, out_dim)
    assert jnp.allclose(out, ref, atol=1e-4, rtol=1e-4)

    # Also exercise the num_layers == 1 branch of the module spec.
    mlp1 = SimpleMLPPallas(in_dim, hidden_dim, out_dim, 1, kp)
    out1 = jax.block_until_ready(mlp1(x))
    ref1 = _reference_forward(mlp1.params, x, 1)
    assert out1.shape == (batch, out_dim)
    assert jnp.allclose(out1, ref1, atol=1e-4, rtol=1e-4)

    print("KERNEL_OK")
</pallas_src>

<mosaic_0001>
module attributes {stable_mosaic.version = 11 : i64} {
  func.func @_fused_mlp_kernel(%arg0: i32, %arg1: memref<8x128xf32, #tpu.memory_space<vmem>>, %arg2: memref<3x128x128xf32, #tpu.memory_space<vmem>>, %arg3: memref<3x1x128xf32, #tpu.memory_space<vmem>>, %arg4: memref<8x128xf32, #tpu.memory_space<vmem>>) attributes {dimension_semantics = [#tpu.dimension_semantics<arbitrary>], iteration_bounds = array<i64: 1>, scalar_prefetch = 0 : i64, scratch_operands = 0 : i64, tpu.core_type = #tpu.core_type<tc>, window_params = [{pipeline_mode = #tpu.pipeline_mode<synchronous>, transform_indices = @transform_0, window_bounds = array<i64: 8, 128>}, {pipeline_mode = #tpu.pipeline_mode<synchronous>, transform_indices = @transform_1, window_bounds = array<i64: 3, 128, 128>}, {pipeline_mode = #tpu.pipeline_mode<synchronous>, transform_indices = @transform_2, window_bounds = array<i64: 3, 1, 128>}, {pipeline_mode = #tpu.pipeline_mode<synchronous>, transform_indices = @transform_3, window_bounds = array<i64: 8, 128>}]} {
    %c0 = arith.constant 0 : index
    %c0_0 = arith.constant 0 : index
    %0 = vector.load %arg1[%c0, %c0_0] : memref<8x128xf32, #tpu.memory_space<vmem>>, vector<8x128xf32>
    %c0_1 = arith.constant 0 : index
    %c0_2 = arith.constant 0 : index
    %c0_3 = arith.constant 0 : index
    %1 = vector.load %arg2[%c0_1, %c0_2, %c0_3] : memref<3x128x128xf32, #tpu.memory_space<vmem>>, vector<1x128x128xf32>
    %2 = vector.shape_cast %1 : vector<1x128x128xf32> to vector<128x128xf32>
    %cst = arith.constant dense<0.000000e+00> : vector<8x128xf32>
    %3 = tpu.matmul %0, %2, %cst {dimension_numbers = #tpu.dot_dimension_numbers<[1], [0], [0], [1], [0, 0, 1, 1], [], []>} : vector<8x128xf32>, vector<128x128xf32>, vector<8x128xf32> -> vector<8x128xf32>
    %c0_4 = arith.constant 0 : index
    %c0_5 = arith.constant 0 : index
    %c0_6 = arith.constant 0 : index
    %4 = vector.load %arg3[%c0_4, %c0_5, %c0_6] : memref<3x1x128xf32, #tpu.memory_space<vmem>>, vector<1x1x128xf32>
    %5 = vector.shape_cast %4 : vector<1x1x128xf32> to vector<1x128xf32>
    %6 = vector.broadcast %5 : vector<1x128xf32> to vector<8x128xf32>
    %7 = arith.addf %3, %6 : vector<8x128xf32>
    %cst_7 = arith.constant 0.000000e+00 : f32
    %8 = vector.broadcast %cst_7 : f32 to vector<8x128xf32>
    %9 = arith.maximumf %7, %8 : vector<8x128xf32>
    %c1 = arith.constant 1 : index
    %c0_8 = arith.constant 0 : index
    %c0_9 = arith.constant 0 : index
    %10 = vector.load %arg2[%c1, %c0_8, %c0_9] : memref<3x128x128xf32, #tpu.memory_space<vmem>>, vector<1x128x128xf32>
    %11 = vector.shape_cast %10 : vector<1x128x128xf32> to vector<128x128xf32>
    %cst_10 = arith.constant dense<0.000000e+00> : vector<8x128xf32>
    %12 = tpu.matmul %9, %11, %cst_10 {dimension_numbers = #tpu.dot_dimension_numbers<[1], [0], [0], [1], [0, 0, 1, 1], [], []>} : vector<8x128xf32>, vector<128x128xf32>, vector<8x128xf32> -> vector<8x128xf32>
    %c1_11 = arith.constant 1 : index
    %c0_12 = arith.constant 0 : index
    %c0_13 = arith.constant 0 : index
    %13 = vector.load %arg3[%c1_11, %c0_12, %c0_13] : memref<3x1x128xf32, #tpu.memory_space<vmem>>, vector<1x1x128xf32>
    %14 = vector.shape_cast %13 : vector<1x1x128xf32> to vector<1x128xf32>
    %15 = vector.broadcast %14 : vector<1x128xf32> to vector<8x128xf32>
    %16 = arith.addf %12, %15 : vector<8x128xf32>
    %cst_14 = arith.constant 0.000000e+00 : f32
    %17 = vector.broadcast %cst_14 : f32 to vector<8x128xf32>
    %18 = arith.maximumf %16, %17 : vector<8x128xf32>
    %c2 = arith.constant 2 : index
    %c0_15 = arith.constant 0 : index
    %c0_16 = arith.constant 0 : index
    %19 = vector.load %arg2[%c2, %c0_15, %c0_16] : memref<3x128x128xf32, #tpu.memory_space<vmem>>, vector<1x128x128xf32>
    %20 = vector.shape_cast %19 : vector<1x128x128xf32> to vector<128x128xf32>
    %cst_17 = arith.constant dense<0.000000e+00> : vector<8x128xf32>
    %21 = tpu.matmul %18, %20, %cst_17 {dimension_numbers = #tpu.dot_dimension_numbers<[1], [0], [0], [1], [0, 0, 1, 1], [], []>} : vector<8x128xf32>, vector<128x128xf32>, vector<8x128xf32> -> vector<8x128xf32>
    %c2_18 = arith.constant 2 : index
    %c0_19 = arith.constant 0 : index
    %c0_20 = arith.constant 0 : index
    %22 = vector.load %arg3[%c2_18, %c0_19, %c0_20] : memref<3x1x128xf32, #tpu.memory_space<vmem>>, vector<1x1x128xf32>
    %23 = vector.shape_cast %22 : vector<1x1x128xf32> to vector<1x128xf32>
    %24 = vector.broadcast %23 : vector<1x128xf32> to vector<8x128xf32>
    %25 = arith.addf %21, %24 : vector<8x128xf32>
    %c0_21 = arith.constant 0 : index
    %c0_22 = arith.constant 0 : index
    %26 = vector.load %arg4[%c0_21, %c0_22] : memref<8x128xf32, #tpu.memory_space<vmem>>, vector<8x128xf32>
    tpu.vector_store %arg4[%c0_21, %c0_22], %25 {strides = array<i32>} : memref<8x128xf32, #tpu.memory_space<vmem>>, vector<8x128xf32>,
    return
  }
  func.func @transform_0(%arg0: i32) -> (i32, i32) {
    %c0_i32 = arith.constant 0 : i32
    %c0_i32_0 = arith.constant 0 : i32
    %c0_i32_1 = arith.constant 0 : i32
    return %c0_i32, %c0_i32_0 : i32, i32
  }
  func.func @transform_1(%arg0: i32) -> (i32, i32, i32) {
    %c0_i32 = arith.constant 0 : i32
    %c0_i32_0 = arith.constant 0 : i32
    %c0_i32_1 = arith.constant 0 : i32
    %c0_i32_2 = arith.constant 0 : i32
    return %c0_i32, %c0_i32_0, %c0_i32_1 : i32, i32, i32
  }
  func.func @transform_2(%arg0: i32) -> (i32, i32, i32) {
    %c0_i32 = arith.constant 0 : i32
    %c0_i32_0 = arith.constant 0 : i32
    %c0_i32_1 = arith.constant 0 : i32
    %c0_i32_2 = arith.constant 0 : i32
    return %c0_i32, %c0_i32_0, %c0_i32_1 : i32, i32, i32
  }
  func.func @transform_3(%arg0: i32) -> (i32, i32) {
    %c0_i32 = arith.constant 0 : i32
    %c0_i32_0 = arith.constant 0 : i32
    %c0_i32_1 = arith.constant 0 : i32
    return %c0_i32, %c0_i32_0 : i32, i32
  }
}

</mosaic_0001>

<bundles_post_ra>
// kernel: fused_mlp_forward.1
= control target key start
LH: loop header
LB: loop body
LE: loop exit
PB: predicated region body
PF: predicated region fallthrough
CT: control target
= control target key end

     0   :  { %8 = vsyncpa [#allocation3], 0  ;;  %s712_s0 = inlined_call_operand.vmem [shape: f32[8,128], index: 0, kind: input, shape index: {}]   ;;  %s713_s1 = inlined_call_operand.hbm [shape: f32[3,128,128], index: 1, kind: input, shape index: {}]   ;;  %s714_s2 = inlined_call_operand.vmem [shape: f32[3,1,128], index: 2, kind: input, shape index: {}]   ;;  %s715_s3 = inlined_call_operand.hbm [shape: f32[8,128], index: 3, kind: output, shape index: {}]  }
   0x1   :  { %9 = vsyncpa [#allocation4], 0  ;;  %s619_s12 = smov [#allocation2]   ;;  %s571_s16 = scalar_lea.hbm %s713_s1, 6144 }
   0x2   :  { %s17_s13 = sshll.u32 %s619_s12, 4  ;;  %p572_p0 = scmp.ne.s32.totalorder %s713_s1, %s571_s16  ;;  %s18_s13 = int_to_ptr.vmem [resolvable:$true] %s17_s13 }
   0x3   :  { %p575_p1 = scmp.lt.u32.totalorder %s571_s16, %s713_s1 }
   0x5   :  { %p577_p2 = pnand %p575_p1, %p572_p0 }
   0x7   :  { %580 = shalt.err (!%p577_p2)
}
   0x8   :  { %s581_s21 = scalar_lea.vmem %s18_s13, 6144  ;;  %p586_p4 = scmp.lt.s32.totalorder %s18_s13, %s18_s13 }
   0x9   :  { %p582_p3 = scmp.ne.s32.totalorder %s18_s13, %s581_s21  ;;  %p587_p5 = scmp.lt.s32.totalorder %s581_s21, %s581_s21 }
   0xb   :  { %p588_p6 = por %p587_p5, %p586_p4 }
   0xd   :  { %p589_p7 = pnand %p588_p6, %p582_p3 }
   0xf   :  { %592 = shalt.err (!%p589_p7)
}
  0x10   :  { %s620_s22 = smov 128   ;;  %s621_s23 = smov 8  }
  0x11   :  { %23 = dma.hbm_to_vmem [thread:$0]  %s713_s1, 6144, %s18_s13, [#allocation3], %s620_s22, %s620_s22, %s621_s23  }
  0x12   :  { %615 = dma.done.wait [#allocation3], 6144  }
  0x13   :  { %616 = vsyncadd [#allocation3], 4294961152  ;;  %v622_v0 = vmov 0.0|0.0   ;;  %vm623_vm0 = vmmov 0   ;;  %v624_v1 = vmov 0.0   ;;  %v30_v2 = vld [vmem:[#allocation2] sm:$0xff] }
  0x14   :  { %492 = vmatprep.subr.bf16.mxu0 %v622_v0  ;;  %419 = vmatprep.mubr.msk.f32.mxu0 %vm623_vm0, %v624_v1  ;;  %v31_v3 = vld [vmem:[#allocation2 + $0x8] sm:$0xff]  ;;  %v32_v4 = vld [vmem:[#allocation2 + $0x10] sm:$0xff]  ;;  %v33_v6 = vld [vmem:[#allocation2 + $0x18] sm:$0xff]  ;;  %s625_s5 = smov [#allocation5]  }
  0x15   :  { %516 = vmatprep.subr.bf16.mxu1 %v622_v0  ;;  %454 = vmatprep.mubr.msk.f32.mxu1 %vm623_vm0, %v624_v1  ;;  %v493_v5 = vpack.c.bf16 %v31_v3, %v30_v2  ;;  %v496_v7 = vpack.c.bf16 %v33_v6, %v32_v4  ;;  %v34_v8 = vld [vmem:[#allocation2 + $0x20] sm:$0xff]  ;;  %v35_v9 = vld [vmem:[#allocation2 + $0x28] sm:$0xff]  ;;  %v127_v12 = vld [vmem:[#allocation2 + $0x90] sm:$0xff]  ;;  %s322_s6 = sshll.u32 %s625_s5, 4  ;;  %s323_s6 = int_to_ptr.vmem [resolvable:$true] %s322_s6 }
  0x16   :  { %v125_v10 = vld [vmem:[#allocation2 + $0x80] sm:$0xff]  ;;  %v126_v11 = vld [vmem:[#allocation2 + $0x88] sm:$0xff]  ;;  %v128_v13 = vld [vmem:[#allocation2 + $0x98] sm:$0xff]  ;;  %v499_v14 = vpack.c.bf16 %v35_v9, %v34_v8  ;;  %s593_s7 = scalar_lea.vmem %s323_s6, 128  ;;  %p598_p9 = scmp.lt.s32.totalorder %s323_s6, %s323_s6 }
  0x17   :  { %494 = vmatpush3.bf16.msra.mxu0 %v493_v5  ;;  %v517_v15 = vpack.c.bf16 %v126_v11, %v125_v10  ;;  %v36_v16 = vld [vmem:[#allocation2 + $0x30] sm:$0xff]  ;;  %v37_v17 = vld [vmem:[#allocation2 + $0x38] sm:$0xff]  ;;  %v520_v18 = vpack.c.bf16 %v128_v13, %v127_v12  ;;  %v129_v19 = vld [vmem:[#allocation2 + $0xa0] sm:$0xff]  ;;  %p594_p8 = scmp.ne.s32.totalorder %s323_s6, %s593_s7  ;;  %p599_p10 = scmp.lt.s32.totalorder %s593_s7, %s593_s7 }
  0x18   :  { %495 = vmatprep.subr.bf16.mxu0 %v622_v0  ;;  %v130_v20 = vld [vmem:[#allocation2 + $0xa8] sm:$0xff]  ;;  %v502_v21 = vpack.c.bf16 %v37_v17, %v36_v16  ;;  %v38_v22 = vld [vmem:[#allocation2 + $0x40] sm:$0xff]  ;;  %v131_v25 = vld [vmem:[#allocation2 + $0xb0] sm:$0xff] }
  0x19   :  { %518 = vmatpush3.bf16.msra.mxu1 %v517_v15  ;;  %v39_v23 = vld [vmem:[#allocation2 + $0x48] sm:$0xff]  ;;  %v523_v24 = vpack.c.bf16 %v130_v20, %v129_v19  ;;  %v132_v26 = vld [vmem:[#allocation2 + $0xb8] sm:$0xff]  ;;  %v40_v28 = vld [vmem:[#allocation2 + $0x50] sm:$0xff]  ;;  %p600_p11 = por %p599_p10, %p598_p9 }
  0x1a   :  { %519 = vmatprep.subr.bf16.mxu1 %v622_v0  ;;  %v505_v27 = vpack.c.bf16 %v39_v23, %v38_v22  ;;  %v41_v29 = vld [vmem:[#allocation2 + $0x58] sm:$0xff]  ;;  %v526_v30 = vpack.c.bf16 %v132_v26, %v131_v25  ;;  %v133_v31 = vld [vmem:[#allocation2 + $0xc0] sm:$0xff]  ;;  %v134_v32 = vld [vmem:[#allocation2 + $0xc8] sm:$0xff] }
  0x1b   :  { %497 = vmatpush3.bf16.msra.mxu0 %v496_v7  ;;  %v508_v33 = vpack.c.bf16 %v41_v29, %v40_v28  ;;  %v42_v34 = vld [vmem:[#allocation2 + $0x60] sm:$0xff]  ;;  %v43_v35 = vld [vmem:[#allocation2 + $0x68] sm:$0xff]  ;;  %v529_v36 = vpack.c.bf16 %v134_v32, %v133_v31  ;;  %v135_v37 = vld [vmem:[#allocation2 + $0xd0] sm:$0xff]  ;;  %p601_p12 = pnand %p600_p11, %p594_p8 }
  0x1c   :  { %498 = vmatprep.subr.bf16.mxu0 %v622_v0  ;;  %v136_v38 = vld [vmem:[#allocation2 + $0xd8] sm:$0xff]  ;;  %v511_v39 = vpack.c.bf16 %v43_v35, %v42_v34  ;;  %v44_v40 = vld [vmem:[#allocation2 + $0x70] sm:$0xff]  ;;  %v137_v43 = vld [vmem:[#allocation2 + $0xe0] sm:$0xff] }
  0x1d   :  { %521 = vmatpush3.bf16.msra.mxu1 %v520_v18  ;;  %v45_v41 = vld [vmem:[#allocation2 + $0x78] sm:$0xff]  ;;  %v532_v42 = vpack.c.bf16 %v136_v38, %v135_v37  ;;  %v138_v44 = vld [vmem:[#allocation2 + $0xe8] sm:$0xff]  ;;  %v29_v47 = vld [vmem:[%s712_s0] sm:$0xff] }
  0x1e   :  { %522 = vmatprep.subr.bf16.mxu1 %v622_v0  ;;  %v514_v45 = vpack.c.bf16 %v45_v41, %v44_v40  ;;  %v535_v46 = vpack.c.bf16 %v138_v44, %v137_v43  ;;  %v139_v48 = vld [vmem:[#allocation2 + $0xf0] sm:$0xff]  ;;  %v140_v49 = vld [vmem:[#allocation2 + $0xf8] sm:$0xff]  ;;  %v221_v51 = vld [vmem:[#allocation2 + $0x100] sm:$0xff] }
  0x1f   :  { %500 = vmatpush3.bf16.msra.mxu0 %v499_v14  ;;  %v538_v50 = vpack.c.bf16 %v140_v49, %v139_v48  ;;  %v222_v52 = vld [vmem:[#allocation2 + $0x108] sm:$0xff]  ;;  %v223_v53 = vld [vmem:[#allocation2 + $0x110] sm:$0xff]  ;;  %v224_v55 = vld [vmem:[#allocation2 + $0x118] sm:$0xff] }
  0x20   :  { %501 = vmatprep.subr.bf16.mxu0 %v622_v0  ;;  %v541_v54 = vpack.c.bf16 %v222_v52, %v221_v51  ;;  %v544_v56 = vpack.c.bf16 %v224_v55, %v223_v53  ;;  %v225_v57 = vld [vmem:[#allocation2 + $0x120] sm:$0xff]  ;;  %v226_v58 = vld [vmem:[#allocation2 + $0x128] sm:$0xff]  ;;  %v227_v60 = vld [vmem:[#allocation2 + $0x130] sm:$0xff] }
  0x21   :  { %524 = vmatpush3.bf16.msra.mxu1 %v523_v24  ;;  %v547_v59 = vpack.c.bf16 %v226_v58, %v225_v57  ;;  %v228_v61 = vld [vmem:[#allocation2 + $0x138] sm:$0xff]  ;;  %v229_v63 = vld [vmem:[#allocation2 + $0x140] sm:$0xff]  ;;  %v231_v3 = vld [vmem:[#allocation2 + $0x150] sm:$0xff] }
  0x22   :  { %525 = vmatprep.subr.bf16.mxu1 %v622_v0  ;;  %v550_v62 = vpack.c.bf16 %v228_v61, %v227_v60  ;;  %v232_v4 = vld [vmem:[#allocation2 + $0x158] sm:$0xff]  ;;  %v233_v6 = vld [vmem:[#allocation2 + $0x160] sm:$0xff]  ;;  %v234_v7 = vld [vmem:[#allocation2 + $0x168] sm:$0xff] }
  0x23   :  { %503 = vmatpush3.bf16.msra.mxu0 %v502_v21  ;;  %v556_v5 = vpack.c.bf16 %v232_v4, %v231_v3  ;;  %v559_v8 = vpack.c.bf16 %v234_v7, %v233_v6  ;;  %v331_v9 = vld [vmem:[%s714_s2] ss:$0 sm:$0xff]  ;;  %v235_v14 = vld [vmem:[#allocation2 + $0x170] sm:$0xff]  ;;  %v236_v15 = vld [vmem:[#allocation2 + $0x178] sm:$0xff] }
  0x24   :  { %504 = vmatprep.subr.bf16.mxu0 %v622_v0  ;;  %v562_v16 = vpack.c.bf16 %v236_v15, %v235_v14  ;;  %v333_v17 = vld [vmem:[%s714_s2 + $0x1] ss:$0 sm:$0xff]  ;;  %v335_v21 = vld [vmem:[%s714_s2 + $0x2] ss:$0 sm:$0xff] }
  0x25   :  { %527 = vmatpush3.bf16.msra.mxu1 %v526_v30 }
  0x26   :  { %528 = vmatprep.subr.bf16.mxu1 %v622_v0 }
  0x27   :  { %506 = vmatpush3.bf16.msra.mxu0 %v505_v27 }
  0x28   :  { %507 = vmatprep.subr.bf16.mxu0 %v622_v0 }
  0x29   :  { %530 = vmatpush3.bf16.msra.mxu1 %v529_v36 }
  0x2a   :  { %531 = vmatprep.subr.bf16.mxu1 %v622_v0 }
  0x2b   :  { %509 = vmatpush3.bf16.msra.mxu0 %v508_v33 }
  0x2c   :  { %510 = vmatprep.subr.bf16.mxu0 %v622_v0 }
  0x2d   :  { %533 = vmatpush3.bf16.msra.mxu1 %v532_v42 }
  0x2e   :  { %534 = vmatprep.subr.bf16.mxu1 %v622_v0 }
  0x2f   :  { %512 = vmatpush3.bf16.msra.mxu0 %v511_v39 }
  0x30   :  { %513 = vmatprep.subr.bf16.mxu0 %v622_v0 }
  0x31   :  { %536 = vmatpush3.bf16.msra.mxu1 %v535_v46 }
  0x32   :  { %537 = vmatprep.subr.bf16.mxu1 %v622_v0 }
  0x33   :  { %515 = vmatpush3.bf16.msra.mxu0 %v514_v45 }
  0x34   :  { %540 = vmatprep.subr.bf16.mxu0 %v622_v0 }
  0x35   :  { %539 = vmatpush3.bf16.msra.mxu1 %v538_v50 }
  0x36   :  { %420 = vmatmul.mubr.f32.vlgmr.msra.gmra.mrb[0].mxu0 %v29_v47 }
  0x37   :  { %489 = vmatprep.mubr.msk.f32.mxu0 %vm623_vm0, %v624_v1  ;;  %542 = vmatpush3.bf16.msra.mxu0 %v541_v54  ;;  %v230_v1 = vld [vmem:[#allocation2 + $0x148] sm:$0xff] }
  0x38   :  { %543 = vmatprep.subr.bf16.mxu0 %v622_v0  ;;  %v553_v2 = vpack.c.bf16 %v230_v1, %v229_v63 }
  0x3b   :  { %545 = vmatpush3.bf16.msra.mxu0 %v544_v56 }
  0x3c   :  { %546 = vmatprep.subr.bf16.mxu0 %v622_v0 }
  0x3f   :  { %548 = vmatpush3.bf16.msra.mxu0 %v547_v59 }
  0x40   :  { %549 = vmatprep.subr.bf16.mxu0 %v622_v0 }
  0x43   :  { %551 = vmatpush3.bf16.msra.mxu0 %v550_v62 }
  0x44   :  { %552 = vmatprep.subr.bf16.mxu0 %v622_v0 }
  0x47   :  { %554 = vmatpush3.bf16.msra.mxu0 %v553_v2 }
  0x48   :  { %555 = vmatprep.subr.bf16.mxu0 %v622_v0 }
  0x4b   :  { %557 = vmatpush3.bf16.msra.mxu0 %v556_v5 }
  0x4c   :  { %558 = vmatprep.subr.bf16.mxu0 %v622_v0 }
  0x4f   :  { %560 = vmatpush3.bf16.msra.mxu0 %v559_v8 }
  0x50   :  { %561 = vmatprep.subr.bf16.mxu0 %v622_v0 }
  0x53   :  { %563 = vmatpush3.bf16.msra.mxu0 %v562_v16 }
 0x109   :  { %v119_v10 = vpop.f32.mrb[0].mxu0 }
 0x10a   :  { %v120_v11 = vadd.f32 %v331_v9, %v119_v10  ;;  %v421_v12 = vpop.f32.mrb[1].mxu0 }
 0x10c   :  { %v123_v13 = vmax.f32 %v120_v11, 0.0 }
 0x10e   :  { %455 = vmatmul.mubr.f32.vlgmr.msra.gmra.mrb[0].mxu1 %v123_v13 }
 0x1e1   :  { %v215_v18 = vpop.f32.mrb[0].mxu1 }
 0x1e2   :  { %v216_v19 = vadd.f32 %v333_v17, %v215_v18  ;;  %v456_v0 = vpop.f32.mrb[1].mxu1 }
 0x1e4   :  { %v219_v20 = vmax.f32 %v216_v19, 0.0 }
 0x1e6   :  { %490 = vmatmul.mubr.f32.vlgmr.msra.gmra.mrb[2].mxu0 %v219_v20 }
 0x2b9   :  { %v311_v22 = vpop.f32.mrb[2].mxu0 }
 0x2ba   :  { %v312_v23 = vadd.f32 %v335_v21, %v311_v22  ;;  %v491_v24 = vpop.f32.mrb[3].mxu0 }
 0x2bc   :  { %315 = vst [vmem:[#allocation5] sm:$0xff] %v312_v23 }
 0x2bd   :  { %604 = shalt.err (!%p601_p12)
}
 0x2be   :  { %s605_s10 = scalar_lea.hbm %s715_s3, 128 }
 0x2bf   :  { %p606_p13 = scmp.ne.s32.totalorder %s715_s3, %s605_s10  ;;  %p609_p0 = scmp.lt.u32.totalorder %s605_s10, %s715_s3 }
 0x2c1   :  { %p611_p1 = pnand %p609_p0, %p606_p13 }
 0x2c3   :  { %614 = shalt.err (!%p611_p1)
}
 0x2c4   :  { %325 = dma.vmem_to_hbm [thread:$0]  %s323_s6, 128, %s715_s3, [#allocation4]  }
 0x2c5   :  { %617 = dma.done.wait [#allocation4], 128  }
 0x2c6   :  { %618 = vsyncadd [#allocation4], 4294967168 }
 0x2c7   :  { %329 = vsyncpa [#allocation3], 1 }
 0x2c8   :  { %330 = vsyncpa [#allocation4], 1 }

</bundles_post_ra>
